<compile_context>
chip_gen: v5e
topology: v5e:2x2
jax: 0.10.0
libtpu: 0.0.40
codegen_flags: <defaults>
</compile_context>

<pallas_src>
import math

import jax
import jax.numpy as jnp
from jax.experimental import pallas as pl
from jax.experimental.pallas import tpu as pltpu


TILE_N = 8  # batch tile (sublane-aligned); raise freely for real batches —
            # with the pooled (N, Pd) input, VMEM stays trivial on all gens.


# ---------------------------------------------------------------------------
# Fused kernel (per batch tile): fused (patch-embed @ proj) matmul (bf16 MXU,
# f32 accumulate) -> L2-normalize -> cosine against (k-scaled) text_enc.
# Emits per-row scaled dots; the wrapper computes loss = 1 - mean(dots).
# ---------------------------------------------------------------------------
def _encode_dots_kernel(pooled_ref, w_ref, b_ref, text_ref, dots_ref):
    # Fused patch-embed + projection (normalization affine folded into w/b).
    img_enc = jnp.dot(pooled_ref[...], w_ref[...],
                      preferred_element_type=jnp.float32) + b_ref[...]   # (T, Ep) f32
    # L2 normalization in f32 (eps avoids inf on an all-zero row).
    inv_norm = jax.lax.rsqrt(
        jnp.sum(img_enc * img_enc, axis=-1, keepdims=True) + 1e-12)
    img_enc = img_enc * inv_norm
    # Cosine logits against the k-scaled text embedding (VPU mult + lane reduce).
    dots = jnp.sum(img_enc * text_ref[...], axis=-1, keepdims=True)      # (T, 1)
    # Lane-dense store (avoid masked vst on a 1-lane-wide output).
    dots_ref[...] = jnp.broadcast_to(dots, dots_ref.shape)


def encode_and_dots_pallas(pooled, w_fused, b_fused, text_scaled):
    n_pad, pd = pooled.shape
    e_pad = w_fused.shape[1]
    num_tiles = n_pad // TILE_N
    dots = pl.pallas_call(
        _encode_dots_kernel,
        out_shape=jax.ShapeDtypeStruct((n_pad, 128), jnp.float32),
        grid=(num_tiles,),
        in_specs=[
            pl.BlockSpec((TILE_N, pd), lambda i: (i, 0)),    # pooled (bf16)
            pl.BlockSpec((pd, e_pad), lambda i: (0, 0)),     # fused weight (bf16)
            pl.BlockSpec((1, e_pad), lambda i: (0, 0)),      # fused bias (f32)
            pl.BlockSpec((1, e_pad), lambda i: (0, 0)),      # k * text_enc (f32)
        ],
        out_specs=pl.BlockSpec((TILE_N, 128), lambda i: (i, 0)),
        compiler_params=pltpu.CompilerParams(
            dimension_semantics=("parallel",)),
    )(pooled, w_fused, b_fused, text_scaled)
    return dots


# ---------------------------------------------------------------------------
# ClipLoss module equivalent
# ---------------------------------------------------------------------------
class ClipLossPallas:
    # small synthetic "ViT-B/32"-shaped encoder
    RESOLUTION = 32     # visual.input_resolution (downscaled for the demo)
    PATCH = 8           # patch size (downscaled from 32)
    WIDTH = 128         # transformer width (downscaled from 768)
    EMBED = 64          # joint embedding dim (downscaled from 512)
    PD_PAD = 256        # lane-padded patch dim  (3*8*8 = 192 -> 256)
    E_PAD = 128         # lane-padded embed dim  (64 -> 128)
    CLIP_MEAN = (0.48145466, 0.4578275, 0.40821073)
    CLIP_STD = (0.26862954, 0.26130258, 0.27577711)

    def __init__(self, key):
        k1, k2, k3 = jax.random.split(key, 3)
        p = self.PATCH
        patch_dim = 3 * p * p
        # patch embedding conv weight (width, C, P, P) flattened to (Pd, width)
        w_patch = (0.02 * jax.random.normal(
            k1, (patch_dim, self.WIDTH))).astype(jnp.float32)
        proj = (0.02 * jax.random.normal(
            k2, (self.WIDTH, self.EMBED))).astype(jnp.float32)
        # text_enc buffer: pre-normalized target text embedding (1, E)
        te = jax.random.normal(k3, (1, self.EMBED)).astype(jnp.float32)
        te = te / jnp.linalg.norm(te, axis=-1, keepdims=True)

        # Fold CLIP normalization  ((x+1)/2 - mean)/std = x*scale_c + bias_c
        # into the linear patch-embed, and fuse patch-embed @ proj.
        # Preconditions (hold as written): inputs in [-1,1]; patch_dim ordering
        # is (C, P, P) matching the wrapper's pooling layout.
        mean = jnp.asarray(self.CLIP_MEAN, jnp.float32)
        std = jnp.asarray(self.CLIP_STD, jnp.float32)
        scale_c = 1.0 / (2.0 * std)                  # (C,)
        bias_c = (0.5 - mean) / std                  # (C,)
        scale_row = jnp.repeat(scale_c, p * p)       # (Pd,)  channel = d // (P*P)
        bias_row = jnp.repeat(bias_c, p * p)         # (Pd,)
        w_fused = (scale_row[:, None] * w_patch) @ proj              # (Pd, E)
        b_fused = ((bias_row @ w_patch) @ proj).reshape(1, self.EMBED)

        # Zero-pad lane dims: Pd -> PD_PAD, E -> E_PAD (zeros are inert in the
        # matmul, L2 norm and cosine).
        w_fused = jnp.pad(w_fused, ((0, self.PD_PAD - patch_dim),
                                    (0, self.E_PAD - self.EMBED)))
        b_fused = jnp.pad(b_fused, ((0, 0), (0, self.E_PAD - self.EMBED)))
        te = jnp.pad(te, ((0, 0), (0, self.E_PAD - self.EMBED)))

        # CLIP's logit_scale init is ln(1/0.07); fold exp(.)/100 into text_enc
        # (init-time constant) so the kernel has no scalar operand.
        logit_scale = jnp.float32(math.log(1.0 / 0.07))
        k = jnp.exp(logit_scale) / 100.0

        self.w_fused = w_fused.astype(jnp.bfloat16)          # bf16 MXU operand
        self.b_fused = b_fused.astype(jnp.float32)
        self.text_scaled = (k * te).astype(jnp.float32)

    def __call__(self, imgs):
        n, c, h, w = imgs.shape
        imgs = imgs.astype(jnp.float32)
        if (h, w) != (self.RESOLUTION, self.RESOLUTION):
            # TODO(synk): bilinear resize (resize_imgs) left as XLA glue — no
            # clean Pallas equivalent worth writing at this size.
            imgs = jax.image.resize(
                imgs, (n, c, self.RESOLUTION, self.RESOLUTION),
                method="bilinear")
        # Pool-before-matmul: mean over the patch grid (== token mean of the
        # patch sequence, since the encoder is linear).  No transpose, no
        # (N, T, Pd) materialization.
        p = self.PATCH
        g = self.RESOLUTION // p
        pooled = imgs.reshape(n, c, g, p, g, p).mean(axis=(2, 4))
        pooled = pooled.reshape(n, c * p * p)                         # (N, Pd)
        # Lane-pad Pd and batch-pad to a multiple of TILE_N (padded rows are
        # sliced off after the kernel).
        pooled = jnp.pad(pooled, ((0, 0), (0, self.PD_PAD - pooled.shape[1])))
        n_pad = ((n + TILE_N - 1) // TILE_N) * TILE_N
        pooled = jnp.pad(pooled, ((0, n_pad - n), (0, 0))).astype(jnp.bfloat16)

        dots = encode_and_dots_pallas(
            pooled, self.w_fused, self.b_fused, self.text_scaled)
        # loss = mean(1 - (exp(logit_scale)/100) * <img_enc, text_enc>)
        return (1.0 - jnp.mean(dots[:n, 0])).astype(jnp.float32)


if __name__ == "__main__":
    key = jax.random.PRNGKey(0)
    k_img, k_params = jax.random.split(key)
    # imgs in [-1, 1], NCHW, like the generator outputs fed to ClipLoss
    imgs = jax.random.uniform(k_img, (2, 3, 16, 16),
                              minval=-1.0, maxval=1.0, dtype=jnp.float32)
    loss_mod = ClipLossPallas(k_params)
    loss = loss_mod(imgs)
    jax.block_until_ready(loss)
    assert loss.shape == () and loss.dtype == jnp.float32
    assert bool(jnp.isfinite(loss))
    print("KERNEL_OK")
</pallas_src>

<mosaic_0001>
module attributes {stable_mosaic.version = 11 : i64} {
  func.func @_encode_dots_kernel(%arg0: i32, %arg1: memref<8x256xbf16, #tpu.memory_space<vmem>>, %arg2: memref<256x128xbf16, #tpu.memory_space<vmem>>, %arg3: memref<1x128xf32, #tpu.memory_space<vmem>>, %arg4: memref<1x128xf32, #tpu.memory_space<vmem>>, %arg5: memref<8x128xf32, #tpu.memory_space<vmem>>) attributes {dimension_semantics = [#tpu.dimension_semantics<parallel>], iteration_bounds = array<i64: 1>, scalar_prefetch = 0 : i64, scratch_operands = 0 : i64, tpu.core_type = #tpu.core_type<tc>, window_params = [{transform_indices = @transform_0, window_bounds = array<i64: 8, 256>}, {pipeline_mode = #tpu.pipeline_mode<synchronous>, transform_indices = @transform_1, window_bounds = array<i64: 256, 128>}, {pipeline_mode = #tpu.pipeline_mode<synchronous>, transform_indices = @transform_2, window_bounds = array<i64: 1, 128>}, {pipeline_mode = #tpu.pipeline_mode<synchronous>, transform_indices = @transform_3, window_bounds = array<i64: 1, 128>}, {transform_indices = @transform_4, window_bounds = array<i64: 8, 128>}]} {
    %c0 = arith.constant 0 : index
    %c0_0 = arith.constant 0 : index
    %0 = vector.load %arg1[%c0, %c0_0] : memref<8x256xbf16, #tpu.memory_space<vmem>>, vector<8x256xbf16>
    %c0_1 = arith.constant 0 : index
    %c0_2 = arith.constant 0 : index
    %1 = vector.load %arg2[%c0_1, %c0_2] : memref<256x128xbf16, #tpu.memory_space<vmem>>, vector<256x128xbf16>
    %cst = arith.constant dense<0.000000e+00> : vector<8x128xf32>
    %2 = tpu.matmul %0, %1, %cst {dimension_numbers = #tpu.dot_dimension_numbers<[1], [0], [0], [1], [0, 0, 1, 1], [], []>} : vector<8x256xbf16>, vector<256x128xbf16>, vector<8x128xf32> -> vector<8x128xf32>
    %c0_3 = arith.constant 0 : index
    %c0_4 = arith.constant 0 : index
    %3 = vector.load %arg3[%c0_3, %c0_4] : memref<1x128xf32, #tpu.memory_space<vmem>>, vector<1x128xf32>
    %4 = vector.broadcast %3 : vector<1x128xf32> to vector<8x128xf32>
    %5 = arith.addf %2, %4 : vector<8x128xf32>
    %6 = arith.mulf %5, %5 : vector<8x128xf32>
    %cst_5 = arith.constant dense<0.000000e+00> : vector<8xf32>
    %7 = vector.multi_reduction <add>, %6, %cst_5 [1] : vector<8x128xf32> to vector<8xf32>
    %8 = vector.shape_cast %7 : vector<8xf32> to vector<8x1xf32>
    %cst_6 = arith.constant 9.99999996E-13 : f32
    %9 = vector.broadcast %cst_6 : f32 to vector<8x1xf32>
    %10 = arith.addf %8, %9 : vector<8x1xf32>
    %11 = math.rsqrt %10 : vector<8x1xf32>
    %12 = vector.broadcast %11 : vector<8x1xf32> to vector<8x128xf32>
    %13 = arith.mulf %5, %12 : vector<8x128xf32>
    %c0_7 = arith.constant 0 : index
    %c0_8 = arith.constant 0 : index
    %14 = vector.load %arg4[%c0_7, %c0_8] : memref<1x128xf32, #tpu.memory_space<vmem>>, vector<1x128xf32>
    %15 = vector.broadcast %14 : vector<1x128xf32> to vector<8x128xf32>
    %16 = arith.mulf %13, %15 : vector<8x128xf32>
    %cst_9 = arith.constant dense<0.000000e+00> : vector<8xf32>
    %17 = vector.multi_reduction <add>, %16, %cst_9 [1] : vector<8x128xf32> to vector<8xf32>
    %18 = vector.shape_cast %17 : vector<8xf32> to vector<8x1xf32>
    %19 = vector.shape_cast %18 : vector<8x1xf32> to vector<8x1xf32>
    %20 = vector.broadcast %19 : vector<8x1xf32> to vector<8x128xf32>
    %c0_10 = arith.constant 0 : index
    %c0_11 = arith.constant 0 : index
    %21 = vector.load %arg5[%c0_10, %c0_11] : memref<8x128xf32, #tpu.memory_space<vmem>>, vector<8x128xf32>
    tpu.vector_store %arg5[%c0_10, %c0_11], %20 {strides = array<i32>} : memref<8x128xf32, #tpu.memory_space<vmem>>, vector<8x128xf32>,
    return
  }
  func.func @transform_0(%arg0: i32) -> (i32, i32) {
    %c0_i32 = arith.constant 0 : i32
    %c0_i32_0 = arith.constant 0 : i32
    return %arg0, %c0_i32 : i32, i32
  }
  func.func @transform_1(%arg0: i32) -> (i32, i32) {
    %c0_i32 = arith.constant 0 : i32
    %c0_i32_0 = arith.constant 0 : i32
    %c0_i32_1 = arith.constant 0 : i32
    return %c0_i32, %c0_i32_0 : i32, i32
  }
  func.func @transform_2(%arg0: i32) -> (i32, i32) {
    %c0_i32 = arith.constant 0 : i32
    %c0_i32_0 = arith.constant 0 : i32
    %c0_i32_1 = arith.constant 0 : i32
    return %c0_i32, %c0_i32_0 : i32, i32
  }
  func.func @transform_3(%arg0: i32) -> (i32, i32) {
    %c0_i32 = arith.constant 0 : i32
    %c0_i32_0 = arith.constant 0 : i32
    %c0_i32_1 = arith.constant 0 : i32
    return %c0_i32, %c0_i32_0 : i32, i32
  }
  func.func @transform_4(%arg0: i32) -> (i32, i32) {
    %c0_i32 = arith.constant 0 : i32
    %c0_i32_0 = arith.constant 0 : i32
    return %arg0, %c0_i32 : i32, i32
  }
}

</mosaic_0001>

<bundles_post_ra>
// kernel: tpu_custom_call.1
= control target key start
LH: loop header
LB: loop body
LE: loop exit
PB: predicated region body
PF: predicated region fallthrough
CT: control target
= control target key end

     0   :  { %9 = vsyncpa [#allocation3], 0  ;;  %s467_s0 = inlined_call_operand.hbm [shape: bf16[8,256], index: 0, kind: input, shape index: {}]   ;;  %s468_s1 = inlined_call_operand.hbm [shape: bf16[256,128], index: 1, kind: input, shape index: {}]   ;;  %s469_s2 = inlined_call_operand.vmem [shape: f32[1,128], index: 2, kind: input, shape index: {}]   ;;  %s470_s3 = inlined_call_operand.vmem [shape: f32[1,128], index: 3, kind: input, shape index: {}]   ;;  %s471_s4 = inlined_call_operand.hbm [shape: f32[8,128], index: 4, kind: output, shape index: {}]  }
   0x1   :  { %10 = vsyncpa [#allocation6], 0 }
   0x2   :  { %11 = vsyncpa [#allocation4], 0  ;;  %s17_s17 = sshll.u32 %s467_s0, 4  ;;  %s422_s18 = smov [#allocation2]   ;;  %s18_s17 = int_to_ptr.hbm [resolvable:$true] %s17_s17 }
   0x3   :  { %s19_s19 = sshll.u32 %s422_s18, 4  ;;  %s27_s22 = sshll.u32 %s468_s1, 4  ;;  %s20_s19 = int_to_ptr.vmem [resolvable:$true] %s19_s19  ;;  %s28_s22 = int_to_ptr.hbm [resolvable:$true] %s27_s22 }
   0x4   :  { %22 = dma.hbm_to_vmem [thread:$0]  %s18_s17, 128, %s20_s19, [#allocation3]  }
   0x5   :  { %s423_s23 = smov [#allocation5]   ;;  %s424_s25 = smov 64  }
   0x6   :  { %s29_s24 = sshll.u32 %s423_s23, 4  ;;  %s425_s26 = smov 4   ;;  %s30_s24 = int_to_ptr.vmem [resolvable:$true] %s29_s24 }
   0x7   :  { %35 = dma.hbm_to_vmem [thread:$0]  %s28_s22, 2048, %s30_s24, [#allocation6], %s424_s25, %s424_s25, %s425_s26  }
   0x8   :  { %416 = dma.done.wait [#allocation3], 128  }
   0x9   :  { %417 = vsyncadd [#allocation3], 4294967168 }
   0xa   :  { %418 = dma.done.wait [#allocation6], 2048  }
   0xb   :  { %419 = vsyncadd [#allocation6], 4294965248  ;;  %v326_v0 = vld [vmem:[#allocation5 + $0x38] sm:$0xff]  ;;  %v325_v2 = vld [vmem:[#allocation5 + $0x30] sm:$0xff]  ;;  %s426_s28 = smov [#allocation7]   ;;  %s244_s6 = sshll.u32 %s471_s4, 4  ;;  %s245_s6 = int_to_ptr.hbm [resolvable:$true] %s244_s6 }
   0xc   :  { %v334_v1 = vld [vmem:[#allocation5 + $0x78] sm:$0xff]  ;;  %188 = vmatpush.bf16.msra.mxu0 %v326_v0  ;;  %v333_v3 = vld [vmem:[#allocation5 + $0x70] sm:$0xff]  ;;  %v324_v4 = vld [vmem:[#allocation5 + $0x28] sm:$0xff]  ;;  %s242_s29 = sshll.u32 %s426_s28, 4  ;;  %s243_s29 = int_to_ptr.vmem [resolvable:$true] %s242_s29 }
   0xd   :  { %201 = vmatpush.bf16.msra.mxu1 %v334_v1  ;;  %v332_v5 = vld [vmem:[#allocation5 + $0x68] sm:$0xff]  ;;  %v323_v6 = vld [vmem:[#allocation5 + $0x20] sm:$0xff]  ;;  %v322_v8 = vld [vmem:[#allocation5 + $0x18] sm:$0xff] }
   0xe   :  { %v331_v7 = vld [vmem:[#allocation5 + $0x60] sm:$0xff]  ;;  %v330_v9 = vld [vmem:[#allocation5 + $0x58] sm:$0xff]  ;;  %v321_v10 = vld [vmem:[#allocation5 + $0x10] sm:$0xff] }
   0xf   :  { %v329_v11 = vld [vmem:[#allocation5 + $0x50] sm:$0xff]  ;;  %v320_v12 = vld [vmem:[#allocation5 + $0x8] sm:$0xff]  ;;  %v48_v14 = vld [vmem:[#allocation2] sm:$0xff] }
  0x10   :  { %189 = vmatpush.bf16.msra.mxu0 %v325_v2  ;;  %v328_v13 = vld [vmem:[#allocation5 + $0x48] sm:$0xff]  ;;  %v86_v15 = vunpack.c.l.b16 %v48_v14  ;;  %v87_v16 = vunpack.c.h.b16 %v48_v14  ;;  %v319_v17 = vld [vmem:[#allocation5] sm:$0xff]  ;;  %v340_v21 = vld [vmem:[%s469_s2] ss:$0 sm:$0xff] }
  0x11   :  { %202 = vmatpush.bf16.msra.mxu1 %v333_v3  ;;  %v327_v18 = vld [vmem:[#allocation5 + $0x40] sm:$0xff]  ;;  %v341_v37 = vld [vmem:[%s470_s3] ss:$0 sm:$0xff] }
  0x12   :  { %v88_v19 = vpack.c.b16 %v86_v15, %v86_v15  ;;  %v89_v20 = vpack.c.b16 %v87_v16, %v87_v16 }
  0x14   :  { %190 = vmatpush.bf16.msra.mxu0 %v324_v4 }
  0x15   :  { %203 = vmatpush.bf16.msra.mxu1 %v332_v5 }
  0x18   :  { %191 = vmatpush.bf16.msra.mxu0 %v323_v6 }
  0x19   :  { %204 = vmatpush.bf16.msra.mxu1 %v331_v7 }
  0x1c   :  { %192 = vmatpush.bf16.msra.mxu0 %v322_v8 }
  0x1d   :  { %205 = vmatpush.bf16.msra.mxu1 %v330_v9 }
  0x20   :  { %193 = vmatpush.bf16.msra.mxu0 %v321_v10 }
  0x21   :  { %206 = vmatpush.bf16.msra.mxu1 %v329_v11 }
  0x24   :  { %194 = vmatpush.bf16.msra.mxu0 %v320_v12 }
  0x25   :  { %207 = vmatpush.bf16.msra.mxu1 %v328_v13 }
  0x28   :  { %195 = vmatpush.bf16.msra.mxu0 %v319_v17 }
  0x29   :  { %208 = vmatpush.bf16.msra.mxu1 %v327_v18 }
  0x2b   :  { %196 = vmatmul.bf16.vlgmr.msra.gmra.mxu0 %v88_v19 }
  0x2c   :  { %209 = vmatmul.bf16.vlgmr.msra.gmra.mxu1 %v89_v20 }
  0xa8   :  { %v197_v22 = vpop.f32.mrf.mxu0 }
  0xa9   :  { %v210_v23 = vpop.f32.mrf.mxu1  ;;  %v198_v24 = vadd.f32 %v340_v21, %v197_v22 }
  0xab   :  { %v211_v25 = vadd.f32 %v210_v23, %v198_v24 }
  0xad   :  { %v214_v26 = vmul.f32 %v211_v25, %v211_v25 }
  0xaf   :  { %215 = vadd.xlane.f32.xlu0 %v214_v26 }
  0xb0   :  { %v199_v27 = vpop.f32.mrf.mxu0 }
  0xb1   :  { %v212_v28 = vpop.f32.mrf.mxu1 }
 0x122   :  { %v216_v29 = vpop.xlane.xlu0 %215 }
 0x123   :  { %v217_v30 = vadd.f32 1e-12, %v216_v29 }
 0x125   :  { %342 = vrsqrt.f32 %v217_v30  ;;  %vm224_vm1 = vweird.f32 %v217_v30 }
 0x12b   :  { %v343_v31 = vpop.eup %342 }
 0x12c   :  { %v219_v32 = vmul.f32 %v343_v31, %v217_v30  ;;  %vm225_vm0 = vweird.f32 %v343_v31 }
 0x12d   :  { %vm226_vm2 = vmor %vm224_vm1, %vm225_vm0 }
 0x12e   :  { %v220_v33 = vmul.f32 %v343_v31, %v219_v32 }
 0x130   :  { %v221_v34 = vmul.f32 0.5, %v220_v33 }
 0x132   :  { %v222_v35 = vsub.f32 1.5, %v221_v34 }
 0x134   :  { %v223_v36 = vmul.f32 %v343_v31, %v222_v35 }
 0x136   :  { %v227_v38 = vsel %vm226_vm2, %v343_v31, %v223_v36 }
 0x137   :  { %v228_v39 = vmul.f32 %v227_v38, %v211_v25 }
 0x139   :  { %v233_v40 = vmul.f32 %v341_v37, %v228_v39 }
 0x13b   :  { %234 = vadd.xlane.f32.xlu0 %v233_v40 }
 0x1ae   :  { %v235_v41 = vpop.xlane.xlu0 %234 }
 0x1af   :  { %236 = vst [vmem:[#allocation7] sm:$0xff] %v235_v41 }
 0x1b0   :  { %247 = dma.vmem_to_hbm [thread:$0]  %s243_s29, 128, %s245_s6, [#allocation4]  }
 0x1b1   :  { %420 = dma.done.wait [#allocation4], 128  }
 0x1b2   :  { %421 = vsyncadd [#allocation4], 4294967168 }
 0x1b3   :  { %252 = vsyncpa [#allocation3], 1 }
 0x1b4   :  { %253 = vsyncpa [#allocation6], 1 }
 0x1b5   :  { %254 = vsyncpa [#allocation4], 1 }

</bundles_post_ra>
